<compile_context>
chip_gen: v5e
topology: v5e:2x2
jax: 0.10.0
libtpu: 0.0.40
codegen_flags: <defaults>
</compile_context>

<pallas_src>
import jax
import jax.numpy as jnp
from jax.experimental import pallas as pl
from jax.experimental.pallas import tpu as pltpu

EPS = 1e-5              # nn.GroupNorm default eps
GROUP_SIZE_GN = 2       # matches the PyTorch module
GROUP_SIZE_LN = 1

# Block-size policy (bytes of f32 activation per grid step).
_TARGET_BLOCK_BYTES = 1 << 20       # aim for ~1 MiB moved per grid step
_SINGLE_PASS_MAX_BYTES = 2 << 20    # above this per-sample size, use tiled path
_TWO_PASS_TILE_BYTES = 2 << 20      # per-tile budget for the tiled path


def _ceil_div(a, b):
    return -(-a // b)


def _round_up(a, b):
    return _ceil_div(a, b) * b


def _vmem_limit_bytes(block_bytes):
    # Explicit scoped-VMEM budget: double-buffered input + output blocks plus
    # the in-kernel f32 temporaries, with headroom.  Kept <= 48 MiB so it also
    # fits v7x (64 MiB physical VMEM per TensorCore).
    want = 8 * block_bytes + (8 << 20)
    return int(min(48 << 20, max(32 << 20, want)))


# --------------------------------------------------------------------------
# Kernels
# --------------------------------------------------------------------------
def _gn_relu_fused_kernel(x_ref, g_ref, b_ref, p_ref, o_ref):
    """Single-pass fused GroupNorm + affine + ReLU for (Nb, C, HWp) blocks.

    p_ref is the (C, C) group-averaging matrix with 1/true_count folded in, so
    `stat @ P` replicates each group's statistic onto its channels.  The HW
    axis may be zero-padded to a lane multiple; padding contributes zero to
    sum / sum-of-squares and the true count lives in P.
    """
    # NOTE: for bf16 inputs this f32 cast doubles the block footprint; the
    # block-size policy accounts for that headroom.
    x = x_ref[...].astype(jnp.float32)                       # (Nb, C, HWp)

    # One pass over the data: per-channel sum and sum of squares (lane reduce).
    s = jnp.sum(x, axis=2)                                   # (Nb, C)
    q = jnp.sum(x * x, axis=2)                               # (Nb, C)

    p = p_ref[...]                                           # (C, C), has 1/count
    mean = jnp.dot(s, p, preferred_element_type=jnp.float32)  # group mean / chan
    ex2 = jnp.dot(q, p, preferred_element_type=jnp.float32)   # group E[x^2] / chan
    var = jnp.maximum(ex2 - mean * mean, 0.0)                # cancellation guard
    inv = jax.lax.rsqrt(var + EPS)                           # (Nb, C)

    g = g_ref[...].astype(jnp.float32)                       # (1, C)
    b = b_ref[...].astype(jnp.float32)                       # (1, C)

    # Fold normalization + affine into a per-channel scale/shift, fuse the ReLU.
    scale = inv * g                                          # (Nb, C)
    shift = b - mean * scale                                 # (Nb, C)
    y = x * scale[:, :, None] + shift[:, :, None]
    o_ref[...] = jnp.maximum(y, 0.0).astype(o_ref.dtype)


def _gn_stats_kernel(x_ref, s_ref, q_ref):
    """Tiled pass 1: accumulate per-(sample, channel) sum / sum-of-squares."""
    @pl.when(pl.program_id(1) == 0)
    def _():
        s_ref[...] = jnp.zeros_like(s_ref)
        q_ref[...] = jnp.zeros_like(q_ref)

    x = x_ref[...].astype(jnp.float32)                       # (1, C, T)
    s_ref[...] += jnp.sum(x, axis=2)[:, None, :]             # (1, 1, C)
    q_ref[...] += jnp.sum(x * x, axis=2)[:, None, :]


def _gn_apply_kernel(x_ref, scale_ref, shift_ref, o_ref):
    """Tiled pass 2: y = relu(x * scale + shift) on lane-dense (1, C, T) tiles."""
    x = x_ref[...].astype(jnp.float32)
    y = x * scale_ref[...] + shift_ref[...]                  # (1, C, 1) broadcasts
    o_ref[...] = jnp.maximum(y, 0.0).astype(o_ref.dtype)


# --------------------------------------------------------------------------
# Wrappers
# --------------------------------------------------------------------------
def _groupnorm_relu_single_pass(x3, g2, b2, p_mat, C, HW):
    N = x3.shape[0]

    # Lane-dense layout: pad HW up to a multiple of 128 so stores are full
    # vst (not masked partial stores).  Zero padding is statistics-neutral.
    hw_p = _round_up(HW, 128)
    if hw_p != HW:
        x3 = jnp.pad(x3, ((0, 0), (0, 0), (0, hw_p - HW)))
    per_sample_bytes = C * hw_p * 4

    # Batch several small samples per grid step (amortize ~0.35us/step), but
    # keep >= 2 grid iterations so both v7x TensorCores get work.
    nb = max(1, min(N, _TARGET_BLOCK_BYTES // per_sample_bytes))
    if N >= 2:
        nb = min(nb, _ceil_div(N, 2))
    n_pad = _round_up(N, nb)
    if n_pad != N:
        x3 = jnp.pad(x3, ((0, n_pad - N), (0, 0), (0, 0)))

    block_bytes = nb * per_sample_bytes
    out = pl.pallas_call(
        _gn_relu_fused_kernel,
        out_shape=jax.ShapeDtypeStruct((n_pad, C, hw_p), x3.dtype),
        grid_spec=pltpu.PrefetchScalarGridSpec(
            num_scalar_prefetch=0,
            grid=(n_pad // nb,),
            in_specs=[
                pl.BlockSpec((nb, C, hw_p), lambda n: (n, 0, 0)),
                pl.BlockSpec((1, C), lambda n: (0, 0)),
                pl.BlockSpec((1, C), lambda n: (0, 0)),
                pl.BlockSpec((C, C), lambda n: (0, 0)),
            ],
            out_specs=pl.BlockSpec((nb, C, hw_p), lambda n: (n, 0, 0)),
        ),
        compiler_params=pltpu.CompilerParams(
            dimension_semantics=("parallel",),
            vmem_limit_bytes=_vmem_limit_bytes(block_bytes),
        ),
    )(x3, g2, b2, p_mat)
    return out[:N, :, :HW]


def _groupnorm_relu_two_pass(x3, g2, b2, p_mat, C, HW):
    N = x3.shape[0]
    out_dtype = x3.dtype

    # Lane-dense tile along HW (multiple of 128) sized to ~_TWO_PASS_TILE_BYTES.
    t = (_TWO_PASS_TILE_BYTES // (4 * C)) // 128 * 128
    t = max(128, min(2048, t))
    t = min(t, _round_up(HW, 128))
    hw_pad = _round_up(HW, t)
    if hw_pad != HW:
        # Zero padding contributes 0 to sum/sumsq; the true count is in p_mat.
        x3 = jnp.pad(x3, ((0, 0), (0, 0), (0, hw_pad - HW)))
    n_tiles = hw_pad // t
    block_bytes = C * t * 4
    vmem = _vmem_limit_bytes(block_bytes)

    # Pass 1: per-(sample, channel) sum and sum of squares, accumulated over tiles.
    s, q = pl.pallas_call(
        _gn_stats_kernel,
        out_shape=(jax.ShapeDtypeStruct((N, 1, C), jnp.float32),
                   jax.ShapeDtypeStruct((N, 1, C), jnp.float32)),
        grid_spec=pltpu.PrefetchScalarGridSpec(
            num_scalar_prefetch=0,
            grid=(N, n_tiles),
            in_specs=[pl.BlockSpec((1, C, t), lambda n, i: (n, 0, i))],
            out_specs=(pl.BlockSpec((1, 1, C), lambda n, i: (n, 0, 0)),
                       pl.BlockSpec((1, 1, C), lambda n, i: (n, 0, 0))),
        ),
        compiler_params=pltpu.CompilerParams(
            dimension_semantics=("parallel", "arbitrary"),
            vmem_limit_bytes=vmem,
        ),
    )(x3)

    # Tiny per-sample epilogue: fold norm + affine into per-channel scale/shift.
    s = s.reshape(N, C)
    q = q.reshape(N, C)
    mean = s @ p_mat
    ex2 = q @ p_mat
    var = jnp.maximum(ex2 - mean * mean, 0.0)
    inv = jax.lax.rsqrt(var + EPS)
    scale2 = inv * g2                        # (N, C)
    shift2 = b2 - mean * scale2
    scale3 = scale2.reshape(N, C, 1)
    shift3 = shift2.reshape(N, C, 1)

    # Pass 2: y = relu(x * scale + shift) on lane-dense tiles.
    y = pl.pallas_call(
        _gn_apply_kernel,
        out_shape=jax.ShapeDtypeStruct((N, C, hw_pad), out_dtype),
        grid_spec=pltpu.PrefetchScalarGridSpec(
            num_scalar_prefetch=0,
            grid=(N, n_tiles),
            in_specs=[
                pl.BlockSpec((1, C, t), lambda n, i: (n, 0, i)),
                pl.BlockSpec((1, C, 1), lambda n, i: (n, 0, 0)),
                pl.BlockSpec((1, C, 1), lambda n, i: (n, 0, 0)),
            ],
            out_specs=pl.BlockSpec((1, C, t), lambda n, i: (n, 0, i)),
        ),
        compiler_params=pltpu.CompilerParams(
            dimension_semantics=("parallel", "parallel"),
            vmem_limit_bytes=vmem,
        ),
    )(x3, scale3, shift3)
    return y[:, :, :HW]


def fused_groupnorm_relu(x, gamma, beta, num_groups=1, *, force_two_pass=False):
    """GroupNorm(num_groups, C, eps=1e-5, affine) + ReLU fused in Pallas.

    x: (N, C, H, W);  gamma, beta: (C,).  num_groups=1 is the 'ln' path of the
    PyTorch module, num_groups=GROUP_SIZE_GN the 'gn' path.
    """
    N, C, H, W = x.shape
    if C % num_groups != 0:
        raise ValueError("C must be divisible by num_groups")
    HW = H * W
    cpg = C // num_groups
    count = cpg * HW                                          # true elems per group

    # (C, C) group-averaging matrix with 1/count folded in:  stat @ P gives each
    # channel its group's mean / E[x^2].
    ch = jnp.arange(C)
    same_group = (ch[:, None] // cpg) == (ch[None, :] // cpg)
    p_mat = same_group.astype(jnp.float32) / float(count)

    g2 = gamma.reshape(1, C).astype(jnp.float32)
    b2 = beta.reshape(1, C).astype(jnp.float32)
    x3 = x.reshape(N, C, HW)

    per_sample_bytes = C * _round_up(HW, 128) * 4
    if force_two_pass or per_sample_bytes > _SINGLE_PASS_MAX_BYTES:
        out = _groupnorm_relu_two_pass(x3, g2, b2, p_mat, C, HW)
    else:
        out = _groupnorm_relu_single_pass(x3, g2, b2, p_mat, C, HW)
    return out.reshape(N, C, H, W)


def conv_block_forward(x, conv_weight, gamma, beta, norm="ln", dropout_value=0.0,
                       mp=True):
    """ConvBlock.forward: Conv2d(3x3, pad=1, no bias) -> MaxPool2d(2,2) -> norm
    -> ReLU -> Dropout(p=dropout_value)."""
    # TODO(synk): the dense 3x3 conv and 2x2 max-pool are left to XLA (lax) ops;
    # only the memory-bound norm + affine + ReLU tail is fused into Pallas.
    y = jax.lax.conv_general_dilated(
        x, conv_weight, window_strides=(1, 1), padding=((1, 1), (1, 1)),
        dimension_numbers=("NCHW", "OIHW", "NCHW"))
    if mp:
        y = jax.lax.reduce_window(
            y, -jnp.inf, jax.lax.max,
            window_dimensions=(1, 1, 2, 2), window_strides=(1, 1, 2, 2),
            padding="VALID")

    if norm == "ln":
        groups = GROUP_SIZE_LN
    elif norm == "gn":
        groups = GROUP_SIZE_GN
    else:
        # TODO(synk): 'bn' (BatchNorm2d) needs running statistics / training
        # state; not implemented in this Pallas port.
        raise ValueError(f"norm type {norm!r} not supported in this Pallas port")

    out = fused_groupnorm_relu(y, gamma, beta, num_groups=groups)
    # Dropout(p=dropout_value): p=0 (module default) is the identity in forward.
    # TODO(synk): training-mode dropout with p>0 (needs RNG) is not implemented.
    del dropout_value
    return out


# --------------------------------------------------------------------------
# Pure-JAX references
# --------------------------------------------------------------------------
def _reference_groupnorm_relu(x, gamma, beta, num_groups):
    N, C, H, W = x.shape
    xf = x.astype(jnp.float32).reshape(N, num_groups, -1)
    mean = xf.mean(axis=-1, keepdims=True)
    var = xf.var(axis=-1, keepdims=True)
    xn = ((xf - mean) * jax.lax.rsqrt(var + EPS)).reshape(N, C, H, W)
    y = xn * gamma[None, :, None, None] + beta[None, :, None, None]
    return jnp.maximum(y, 0.0).astype(x.dtype)


def _reference_conv_block(x, conv_weight, gamma, beta, num_groups, mp=True):
    y = jax.lax.conv_general_dilated(
        x, conv_weight, window_strides=(1, 1), padding=((1, 1), (1, 1)),
        dimension_numbers=("NCHW", "OIHW", "NCHW"))
    if mp:
        y = jax.lax.reduce_window(
            y, -jnp.inf, jax.lax.max,
            window_dimensions=(1, 1, 2, 2), window_strides=(1, 1, 2, 2),
            padding="VALID")
    return _reference_groupnorm_relu(y, gamma, beta, num_groups)


if __name__ == "__main__":
    key = jax.random.PRNGKey(0)
    kx, kw, kg, kb, kx2 = jax.random.split(key, 5)

    # Small ConvBlock shapes: batch=2, in_channels=4, out_channels=8, 16x16 input.
    N, CIN, COUT, H, W = 2, 4, 8, 16, 16
    x = jax.random.normal(kx, (N, CIN, H, W), dtype=jnp.float32)
    conv_weight = 0.1 * jax.random.normal(kw, (COUT, CIN, 3, 3), dtype=jnp.float32)
    gamma = 1.0 + 0.1 * jax.random.normal(kg, (COUT,), dtype=jnp.float32)
    beta = 0.1 * jax.random.normal(kb, (COUT,), dtype=jnp.float32)

    # 1) 'ln' norm path (GroupNorm with 1 group), single-pass fused kernel.
    y = conv_block_forward(x, conv_weight, gamma, beta, norm="ln")
    jax.block_until_ready(y)
    y_ref = _reference_conv_block(x, conv_weight, gamma, beta,
                                  num_groups=GROUP_SIZE_LN)
    assert jnp.allclose(y, y_ref, atol=1e-4, rtol=1e-4), "mismatch vs ref ('ln')"

    # 2) 'gn' norm path (GroupNorm with 2 groups).
    y_gn = conv_block_forward(x, conv_weight, gamma, beta, norm="gn")
    y_gn_ref = _reference_conv_block(x, conv_weight, gamma, beta,
                                     num_groups=GROUP_SIZE_GN)
    assert jnp.allclose(y_gn, y_gn_ref, atol=1e-4, rtol=1e-4), "mismatch vs ref ('gn')"

    # 3) Tiled two-pass path (used automatically for large feature maps / v7x).
    xb = jax.random.normal(kx2, (2, COUT, 64, 64), dtype=jnp.float32)
    yb = fused_groupnorm_relu(xb, gamma, beta, num_groups=1, force_two_pass=True)
    jax.block_until_ready(yb)
    yb_ref = _reference_groupnorm_relu(xb, gamma, beta, num_groups=1)
    assert jnp.allclose(yb, yb_ref, atol=1e-4, rtol=1e-4), "mismatch vs ref (tiled)"

    print("KERNEL_OK")
</pallas_src>

<mosaic_0001>
module attributes {stable_mosaic.version = 11 : i64} {
  func.func @_gn_relu_fused_kernel(%arg0: i32, %arg1: memref<1x8x128xf32, #tpu.memory_space<vmem>>, %arg2: memref<1x8xf32, #tpu.memory_space<vmem>>, %arg3: memref<1x8xf32, #tpu.memory_space<vmem>>, %arg4: memref<8x8xf32, #tpu.memory_space<vmem>>, %arg5: memref<1x8x128xf32, #tpu.memory_space<vmem>>) attributes {dimension_semantics = [#tpu.dimension_semantics<parallel>], iteration_bounds = array<i64: 2>, scalar_prefetch = 0 : i64, scratch_operands = 0 : i64, tpu.core_type = #tpu.core_type<tc>, window_params = [{transform_indices = @transform_0, window_bounds = array<i64: 1, 8, 128>}, {pipeline_mode = #tpu.pipeline_mode<synchronous>, transform_indices = @transform_1, window_bounds = array<i64: 1, 8>}, {pipeline_mode = #tpu.pipeline_mode<synchronous>, transform_indices = @transform_2, window_bounds = array<i64: 1, 8>}, {pipeline_mode = #tpu.pipeline_mode<synchronous>, transform_indices = @transform_3, window_bounds = array<i64: 8, 8>}, {transform_indices = @transform_4, window_bounds = array<i64: 1, 8, 128>}]} {
    %c0 = arith.constant 0 : index
    %c0_0 = arith.constant 0 : index
    %c0_1 = arith.constant 0 : index
    %0 = vector.load %arg1[%c0, %c0_0, %c0_1] : memref<1x8x128xf32, #tpu.memory_space<vmem>>, vector<1x8x128xf32>
    %cst = arith.constant dense<0.000000e+00> : vector<1x8xf32>
    %1 = vector.multi_reduction <add>, %0, %cst [2] : vector<1x8x128xf32> to vector<1x8xf32>
    %2 = arith.mulf %0, %0 : vector<1x8x128xf32>
    %cst_2 = arith.constant dense<0.000000e+00> : vector<1x8xf32>
    %3 = vector.multi_reduction <add>, %2, %cst_2 [2] : vector<1x8x128xf32> to vector<1x8xf32>
    %c0_3 = arith.constant 0 : index
    %c0_4 = arith.constant 0 : index
    %4 = vector.load %arg4[%c0_3, %c0_4] : memref<8x8xf32, #tpu.memory_space<vmem>>, vector<8x8xf32>
    %cst_5 = arith.constant dense<0.000000e+00> : vector<1x8xf32>
    %5 = tpu.matmul %1, %4, %cst_5 {dimension_numbers = #tpu.dot_dimension_numbers<[1], [0], [0], [1], [0, 0, 1, 1], [], []>} : vector<1x8xf32>, vector<8x8xf32>, vector<1x8xf32> -> vector<1x8xf32>
    %cst_6 = arith.constant dense<0.000000e+00> : vector<1x8xf32>
    %6 = tpu.matmul %3, %4, %cst_6 {dimension_numbers = #tpu.dot_dimension_numbers<[1], [0], [0], [1], [0, 0, 1, 1], [], []>} : vector<1x8xf32>, vector<8x8xf32>, vector<1x8xf32> -> vector<1x8xf32>
    %7 = arith.mulf %5, %5 : vector<1x8xf32>
    %8 = arith.subf %6, %7 : vector<1x8xf32>
    %cst_7 = arith.constant 0.000000e+00 : f32
    %9 = vector.broadcast %cst_7 : f32 to vector<1x8xf32>
    %10 = arith.maximumf %8, %9 : vector<1x8xf32>
    %cst_8 = arith.constant 9.99999974E-6 : f32
    %11 = vector.broadcast %cst_8 : f32 to vector<1x8xf32>
    %12 = arith.addf %10, %11 : vector<1x8xf32>
    %13 = math.rsqrt %12 : vector<1x8xf32>
    %c0_9 = arith.constant 0 : index
    %c0_10 = arith.constant 0 : index
    %14 = vector.load %arg2[%c0_9, %c0_10] : memref<1x8xf32, #tpu.memory_space<vmem>>, vector<1x8xf32>
    %c0_11 = arith.constant 0 : index
    %c0_12 = arith.constant 0 : index
    %15 = vector.load %arg3[%c0_11, %c0_12] : memref<1x8xf32, #tpu.memory_space<vmem>>, vector<1x8xf32>
    %16 = arith.mulf %13, %14 : vector<1x8xf32>
    %17 = arith.mulf %5, %16 : vector<1x8xf32>
    %18 = arith.subf %15, %17 : vector<1x8xf32>
    %19 = vector.shape_cast %16 : vector<1x8xf32> to vector<1x8x1xf32>
    %20 = vector.broadcast %19 : vector<1x8x1xf32> to vector<1x8x128xf32>
    %21 = arith.mulf %0, %20 : vector<1x8x128xf32>
    %22 = vector.shape_cast %18 : vector<1x8xf32> to vector<1x8x1xf32>
    %23 = vector.broadcast %22 : vector<1x8x1xf32> to vector<1x8x128xf32>
    %24 = arith.addf %21, %23 : vector<1x8x128xf32>
    %cst_13 = arith.constant 0.000000e+00 : f32
    %25 = vector.broadcast %cst_13 : f32 to vector<1x8x128xf32>
    %26 = arith.maximumf %24, %25 : vector<1x8x128xf32>
    %c0_14 = arith.constant 0 : index
    %c0_15 = arith.constant 0 : index
    %c0_16 = arith.constant 0 : index
    %27 = vector.load %arg5[%c0_14, %c0_15, %c0_16] : memref<1x8x128xf32, #tpu.memory_space<vmem>>, vector<1x8x128xf32>
    tpu.vector_store %arg5[%c0_14, %c0_15, %c0_16], %26 {strides = array<i32>} : memref<1x8x128xf32, #tpu.memory_space<vmem>>, vector<1x8x128xf32>,
    return
  }
  func.func @transform_0(%arg0: i32) -> (i32, i32, i32) {
    %c0_i32 = arith.constant 0 : i32
    %c0_i32_0 = arith.constant 0 : i32
    %c0_i32_1 = arith.constant 0 : i32
    return %arg0, %c0_i32, %c0_i32_0 : i32, i32, i32
  }
  func.func @transform_1(%arg0: i32) -> (i32, i32) {
    %c0_i32 = arith.constant 0 : i32
    %c0_i32_0 = arith.constant 0 : i32
    %c0_i32_1 = arith.constant 0 : i32
    return %c0_i32, %c0_i32_0 : i32, i32
  }
  func.func @transform_2(%arg0: i32) -> (i32, i32) {
    %c0_i32 = arith.constant 0 : i32
    %c0_i32_0 = arith.constant 0 : i32
    %c0_i32_1 = arith.constant 0 : i32
    return %c0_i32, %c0_i32_0 : i32, i32
  }
  func.func @transform_3(%arg0: i32) -> (i32, i32) {
    %c0_i32 = arith.constant 0 : i32
    %c0_i32_0 = arith.constant 0 : i32
    %c0_i32_1 = arith.constant 0 : i32
    return %c0_i32, %c0_i32_0 : i32, i32
  }
  func.func @transform_4(%arg0: i32) -> (i32, i32, i32) {
    %c0_i32 = arith.constant 0 : i32
    %c0_i32_0 = arith.constant 0 : i32
    %c0_i32_1 = arith.constant 0 : i32
    return %arg0, %c0_i32, %c0_i32_0 : i32, i32, i32
  }
}

</mosaic_0001>

<bundles_post_ra>
// kernel: tpu_custom_call.1
= control target key start
LH: loop header
LB: loop body
LE: loop exit
PB: predicated region body
PF: predicated region fallthrough
CT: control target
= control target key end

     0   :  { %9 = vsyncpa [#allocation3], 0  ;;  %s870_s0 = inlined_call_operand.hbm [shape: f32[2,8,128], index: 0, kind: input, shape index: {}]   ;;  %s871_s1 = inlined_call_operand.hbm [shape: f32[1,8], index: 1, kind: input, shape index: {}]   ;;  %s872_s2 = inlined_call_operand.vmem [shape: f32[1,8], index: 2, kind: input, shape index: {}]   ;;  %s873_s3 = inlined_call_operand.hbm [shape: f32[8,8], index: 3, kind: input, shape index: {}]   ;;  %s874_s4 = inlined_call_operand.hbm [shape: f32[2,8,128], index: 4, kind: output, shape index: {}]  }
   0x1   :  { %11 = vsyncpa [#allocation3 + $0x1], 0 }
   0x2   :  { %12 = vsyncpa [#allocation6], 0 }
   0x3   :  { %13 = vsyncpa [#allocation4], 0 }
   0x4   :  { %15 = vsyncpa [#allocation4 + $0x1], 0  ;;  %s722_s15 = smov 0   ;;  %s724_s16 = smov 0  }
   0x5   :  { %s726_s17 = smov 0   ;;  %s728_s18 = smov 0  }
   0x6 LB: > { %s743_s19 = sadd.s32 4294967295, %s693_s18   ;;  %s444_s20 = sadd.s32 4294967294, %s693_s18   ;;  %s693_s18 = sphi %s728_s18, %s884_s18   ;;  %s689_s17 = sphi %s726_s17, %s883_s17   ;;  %s685_s16 = sphi %s724_s16, %s882_s16   ;;  %s681_s15 = sphi %s722_s15, %s881_s15  }
   0x7   : > { %p41_p0 = scmp.ne.s32.totalorder %s685_s16, %s681_s15  ;;  %p42_p1 = scmp.eq.s32.totalorder %s743_s19, 0 }
   0x8   : > { %p128_p2 = scmp.eq.s32.totalorder %s743_s19, 1  ;;  %p134_p3 = scmp.eq.s32.totalorder %s444_s20, 1 }
   0x9   : > { %p752_p4 = por %p42_p1, %p41_p0  ;;  %p445_p5 = scmp.ge.s32.totalorder %s693_s18, 1 }
   0xa   : > { %p757_p6 = por %p134_p3, %p41_p0  ;;  %p141_p7 = scmp.lt.s32.totalorder %s693_s18, 3 }
   0xb   : > { %s153_s25 = sshll.u32 %s871_s1, 4  ;;  %s695_s27 = smov [#allocation5]   ;;  %s154_s25 = int_to_ptr.hbm [resolvable:$true] %s153_s25 }
   0xc   : > { %p765_p8 = pnand %p445_p5, %p141_p7  ;;  %s155_s28 = sshll.u32 %s695_s27, 4  ;;  %s156_s28 = int_to_ptr.vmem [resolvable:$true] %s155_s28 }
   0xd   : > { %s168_s5 = sshll.u32 %s873_s3, 4  ;;  %s696_s6 = smov [#allocation7]   ;;  %s169_s5 = int_to_ptr.hbm [resolvable:$true] %s168_s5 }
   0xe   : > { %p474_p10 = pneg %p765_p8  ;;  %s170_s7 = sshll.u32 %s696_s6, 4  ;;  %s171_s7 = int_to_ptr.vmem [resolvable:$true] %s170_s7 }
   0xf   : > { %s778_s8 = sadd.s32 1, %s693_s18   ;;  %s28_s9 = sadd.s32 1, %s689_s17 }
  0x10   : > { %p475_p11 = pnand %p474_p10, %p42_p1  ;;  %s25_s10 = ssub.s32 %s693_s18, %s778_s8 }
  0x11   : > { %p35_p12 = scmp.ne.s32.totalorder %s689_s17, %s685_s16  ;;  %p26_p13 = scmp.eq.s32.totalorder %s25_s10, 0 }
  0x12   : > { %477 = dma.hbm_to_vmem [thread:$0]  (!%p475_p11), %s154_s25, 16, %s156_s28, [#allocation6]  }
  0x13   : > { %480 = dma.hbm_to_vmem [thread:$0]  (!%p475_p11), %s169_s5, 128, %s171_s7, [#allocation6]  }
  0x14   : > { %p36_p0 = scmp.eq.s32.totalorder %s693_s18, 0  ;;  %p788_p3 = por %p128_p2, %p35_p12 }
  0x15   : > { %p491_p5 = scmp.lt.s32.totalorder %s693_s18, 2  ;;  %s181_s13 = sand.u32 1, %s689_s17  }
  0x16   : > { %s794_s12 = scalar_select %p26_p13, %s689_s17, %s28_s9  }
  0x17   : > { %p37_p7 = por %p36_p0, %p35_p12  ;;  %s449_s14 = sshll.u32 %s181_s13, 3 }
  0x18   : > { %s450_s20 = sshll.u32 %s693_s18, 3  ;;  %s185_s27 = scalar_lea.vmem [#allocation2], %s449_s14 }
  0x19   : > { %s189_s25 = scalar_lea.hbm %s870_s0, %s450_s20  ;;  %s193_s28 = sshll.u32 %s185_s27, 4  ;;  %s194_s28 = int_to_ptr.vmem [resolvable:$true] %s193_s28 }
  0x1a   : > { %s191_s29 = sshll.u32 %s189_s25, 4  ;;  %p801_p2 = pnand %p491_p5, %p37_p7  ;;  %s192_s29 = int_to_ptr.hbm [resolvable:$true] %s191_s29 }
  0x1b   : > { %s182_s5 = scalar_lea.sflag [#allocation3], %s181_s13  ;;  %s593_s6 = sshra.s32 %s192_s29, 4  ;;  %s594_s6 = int_to_ptr.hbm [resolvable:$true] %s593_s6 }
  0x1c   : > { %s595_s7 = scalar_lea.hbm %s594_s6, 8  ;;  %p597_p11 = pneg %p801_p2 }
  0x1d   : > { %p596_p10 = scmp.ne.s32.totalorder %s594_s6, %s595_s7  ;;  %s600_s14 = scalar_lea.hbm %s870_s0, 16 }
  0x1e   : > { %p601_p0 = scmp.lt.s32.totalorder %s594_s6, %s870_s0  ;;  %p602_p5 = scmp.lt.s32.totalorder %s600_s14, %s595_s7 }
  0x1f   : > { %p598_p12 = pnand %p597_p11, %p596_p10 }
  0x20   : > { %p603_p7 = por %p602_p5, %p601_p0 }
  0x21   : > { %p599_p13 = pneg %p598_p12 }
  0x23   : > { %p604_p9 = pnand %p603_p7, %p599_p13 }
  0x25   : > { %607 = shalt.err (!%p604_p9)
}
  0x26   : > { %484 = dma.hbm_to_vmem [thread:$0]  (!%p801_p2), %s192_s29, 128, %s194_s28, %s182_s5  }
  0x27   : > { %202 = sbr.rel (%p765_p8) target bundleno = 458 (0x1ca), region = 36  ;;  %s818_s13 = sand.u32 (!%p765_p8), 1, %s685_s16  }
  0x28   : > { %s452_s24 = sshll.u32 (!%p765_p8), %s818_s13, 3  ;;  %s205_s25 = scalar_lea.sflag (!%p765_p8), [#allocation3], %s818_s13 }
  0x29   : > { %s208_s27 = scalar_lea.vmem (!%p765_p8), [#allocation2], %s452_s24 }
  0x2c   : > { %668 = dma.done.wait (%p752_p4), %s205_s25, 128  }
  0x2d   : > { %670 = vsyncadd (%p752_p4), %s205_s25, 4294967168 }
  0x2e   : > { %672 = dma.done.wait (%p42_p1), [#allocation6], 144  }
  0x2f   : > { %674 = vsyncadd (%p42_p1), [#allocation6], 4294967152  ;;  %v244_v0 = vld [vmem:[%s208_s27] sm:$0xff]  ;;  %v250_v2 = vld [vmem:[#allocation7] sm:$0xff]  ;;  %v252_v3 = vlaneseq  ;;  %vm255_vm0 = vcmask 64512   ;;  %s459_s28 = sshll.u32 %s743_s19, 3 }
  0x30   : > { %245 = vadd.xlane.f32.xlu0 %v244_v0  ;;  %v247_v1 = vmul.f32 %v244_v0, %v244_v0  ;;  %273 = vmatpush.msra.mxu0 %v250_v2  ;;  %v316_v22 = vld [vmem:[#allocation5] sm:$0x1]  ;;  %v317_v27 = vld [vmem:[%s872_s2] sm:$0x1]  ;;  %s350_s5 = scalar_lea.hbm %s874_s4, %s459_s28  ;;  %s243_s6 = scalar_lea.vmem [#allocation8], %s452_s24 }
  0x31   : > { %297 = vmatpush.msra.mxu1 %v250_v2  ;;  %v253_v4 = vand.u32 127, %v252_v3  ;;  %v323_v9 = vshrl.u32 %v252_v3, 7  ;;  %s352_s7 = sshll.u32 %s243_s6, 4  ;;  %s354_s9 = sshll.u32 %s350_s5, 4  ;;  %s353_s7 = int_to_ptr.vmem [resolvable:$true] %s352_s7  ;;  %s355_s9 = int_to_ptr.hbm [resolvable:$true] %s354_s9 }
  0x32   : > { %s340_s10 = scalar_lea.sflag [#allocation4], %s818_s13  ;;  %s637_s14 = sshra.s32 %s355_s9, 4  ;;  %s638_s14 = int_to_ptr.hbm [resolvable:$true] %s637_s14 }
  0x33   : > { %529 = vset.pattern.permute.xlu1 %v323_v9  ;;  %530 = vset.pattern.permute.xlu0 %v323_v9  ;;  %s639_s19 = scalar_lea.hbm %s638_s14, 8  ;;  %s643_s25 = scalar_lea.hbm %s874_s4, 16 }
  0x34   : > { %p640_p1 = scmp.ne.s32.totalorder %s638_s14, %s639_s19  ;;  %p644_p9 = scmp.lt.s32.totalorder %s638_s14, %s874_s4 }
  0x35   : > { %p645_p2 = scmp.lt.s32.totalorder %s643_s25, %s639_s19 }
  0x36   : > { %p641_p4 = pnand %p640_p1, %p788_p3 }
  0x37   : > { %p646_p10 = por %p645_p2, %p644_p9 }
  0x38   : > { %248 = vadd.xlane.f32.xlu0 %v247_v1  ;;  %p642_p8 = pneg %p641_p4 }
  0x3a   : > { %p647_p11 = pnand %p646_p10, %p642_p8 }
  0xa3   : > { %v246_v5 = vpop.xlane.xlu0 %245 }
  0xa4   : > { %v254_v6 = vperm.slane %v246_v5, %v253_v4 }
  0xa6   : > { %456 = vmatmul.msk.f32.vlgmr.msra.gmra.mxu0 %vm255_vm0, %v254_v6 }
  0xab   : > { %v249_v7 = vpop.xlane.xlu0 %248 }
  0xac   : > { %v279_v8 = vperm.slane %v249_v7, %v253_v4 }
  0xae   : > { %457 = vmatmul.msk.f32.vlgmr.msra.gmra.mxu1 %vm255_vm0, %v279_v8 }
 0x123   : > { %v275_v10 = vpop.f32.mrf.mxu0 }
 0x124   : > { %v302_v11 = vmul.f32 %v275_v10, %v275_v10 }
 0x12b   : > { %v299_v12 = vpop.f32.mrf.mxu1 }
 0x12c   : > { %v303_v13 = vsub.f32 %v299_v12, %v302_v11 }
 0x12e   : > { %v304_v14 = vmax.f32 %v303_v13, 0.0 }
 0x130   : > { %v305_v15 = vadd.f32 1e-05, %v304_v14 }
 0x132   : > { %531 = vrsqrt.f32 %v305_v15  ;;  %vm312_vm2 = vweird.f32 %v305_v15 }
 0x138   : > { %v532_v16 = vpop.eup %531 }
 0x139   : > { %v307_v17 = vmul.f32 %v532_v16, %v305_v15  ;;  %vm313_vm1 = vweird.f32 %v532_v16 }
 0x13a   : > { %vm314_vm3 = vmor %vm312_vm2, %vm313_vm1 }
 0x13b   : > { %v308_v18 = vmul.f32 %v532_v16, %v307_v17 }
 0x13d   : > { %v309_v19 = vmul.f32 0.5, %v308_v18 }
 0x13f   : > { %v310_v20 = vsub.f32 1.5, %v309_v19 }
 0x141   : > { %v311_v21 = vmul.f32 %v532_v16, %v310_v20 }
 0x143   : > { %v315_v23 = vsel %vm314_vm3, %v532_v16, %v311_v21 }
 0x144   : > { %v318_v24 = vmul.f32 %v316_v22, %v315_v23 }
 0x146   : > { %v321_v25 = vperm.slane %v318_v24, 0  ;;  %v319_v26 = vmul.f32 %v318_v24, %v275_v10 }
 0x148   : > { %326 = vperm.xlu1 %529, %v321_v25   ;;  %v320_v28 = vsub.f32 %v317_v27, %v319_v26 }
 0x14a   : > { %v329_v29 = vperm.slane %v320_v28, 0 }
 0x150   : > { %334 = vperm.xlu1 %529, %v329_v29  }
 0x1ba   : > { %v327_v30 = vpop.permute.xlu1 %326 }
 0x1bb   : > { %v328_v31 = vmul.f32 %v327_v30, %v244_v0 }
 0x1c2   : > { %v335_v32 = vpop.permute.xlu1 %334 }
 0x1c3   : > { %v336_v33 = vadd.f32 %v335_v32, %v328_v31 }
 0x1c5   : > { %v337_v34 = vmax.f32 %v336_v33, 0.0 }
 0x1c7   : > { %338 = vst [vmem:[%s243_s6] sm:$0xff] %v337_v34 }
 0x1c8   : > { %650 = shalt.err (!%p647_p11)
}
 0x1c9   : > { %472 = dma.vmem_to_hbm [thread:$0]  (%p788_p3), %s353_s7, 128, %s355_s9, %s340_s10  }
 0x1ca PF: > { %s366_s13 = sand.u32 1, %s681_s15   ;;  %p880_p12 = scmp.ge.s32.totalorder %s693_s18, 2 }
 0x1cb   : > { %s367_s21 = scalar_lea.sflag [#allocation4], %s366_s13 }
 0x1cc   : > { %p486_p13 = pnand %p880_p12, %p757_p6 }
 0x1ce   : > { %p487_p0 = pneg %p486_p13 }
 0x1d0   : > { %676 = dma.done.wait (%p487_p0), %s367_s21, 128  }
 0x1d1   : > { %678 = vsyncadd (%p487_p0), %s367_s21, 4294967168  ;;  %p18_p5 = scmp.ge.s32.totalorder %s778_s8, 4   ;;  %s881_s15 = smov %s685_s16 }
 0x1d2   : > { %s882_s16 = smov %s689_s17  ;;  %s883_s17 = smov %s794_s12 }
 0x1d3   : > { %s884_s18 = smov %s778_s8  ;;  %20 = sbr.rel (!%p18_p5) target bundleno = 6 (0x6), region = 89 }
 0x1d8   :  { %373 = vsyncpa [#allocation3], 1 }
 0x1d9   :  { %375 = vsyncpa [#allocation3 + $0x1], 1 }
 0x1da   :  { %376 = vsyncpa [#allocation6], 1 }
 0x1db   :  { %377 = vsyncpa [#allocation4], 1 }
 0x1dc   :  { %379 = vsyncpa [#allocation4 + $0x1], 1 }

</bundles_post_ra>
